<compile_context>
chip_gen: v6e
topology: v6e:2x2x1
jax: 0.10.0
libtpu: 0.0.40
codegen_flags: <defaults>
</compile_context>

<pallas_src>
import functools

import jax
import jax.numpy as jnp
from jax.experimental import pallas as pl
from jax.experimental.pallas import tpu as pltpu


def _round_up(x, m):
    return pl.cdiv(x, m) * m


def heartnet_kernel(x_ref, w1_ref, b1_ref, w2_ref, b2_ref, w3_ref, b3_ref, o_ref):
    # x_ref: [F, TB]  (batch on lanes), weights in [out, in] layout, biases [out, 1].
    x = x_ref[...]

    # Linear(F, 16) + ReLU          -> [16, TB]
    h1 = jnp.dot(w1_ref[...], x, preferred_element_type=jnp.float32) + b1_ref[...]
    h1 = jnp.maximum(h1, 0.0)

    # Dropout(0.2): identity at inference time.
    # TODO(synk): training-mode dropout (pltpu.prng_seed + pltpu.stateful_bernoulli)
    #             is not wired in; this kernel is eval-only.

    # Linear(16, 8) + ReLU          -> [8, TB]
    h2 = (jnp.dot(w2_ref[...], h1.astype(w2_ref.dtype),
                  preferred_element_type=jnp.float32) + b2_ref[...])
    h2 = jnp.maximum(h2, 0.0)

    # Linear(8, 1) + Sigmoid        -> [1, TB]  (lane-dense output store)
    logits = (jnp.dot(w3_ref[...], h2.astype(w3_ref.dtype),
                      preferred_element_type=jnp.float32) + b3_ref[...])
    o_ref[...] = (1.0 / (1.0 + jnp.exp(-logits))).astype(o_ref.dtype)


@functools.partial(jax.jit, static_argnames=("batch_tile", "stream_dtype"))
def heartnet_forward(x, params, *, batch_tile=512, stream_dtype=jnp.float32):
    """x: [B, F] float32; params: dict of w1,b1,w2,b2,w3,b3 (PyTorch [out, in] layout).

    Returns [B, 1] float32 probabilities (eval mode: dropout = identity).
    """
    B, F = x.shape

    # Lane-dense layout: batch -> lanes.
    x_t = jnp.transpose(x).astype(stream_dtype)          # [F, B]

    # Lane (batch) tile: multiple of 128, >= 256 preferred for the v6e/v7x MXU,
    # capped at the (padded) batch so tiny batches still work.
    tb = int(min(_round_up(batch_tile, 128), _round_up(B, 128)))
    b_pad = int(_round_up(B, tb))
    if b_pad != B:
        x_t = jnp.pad(x_t, ((0, 0), (0, b_pad - B)))

    w1 = params["w1"].astype(stream_dtype)   # [16, F]
    b1 = params["b1"].astype(jnp.float32)    # [16, 1]
    w2 = params["w2"].astype(stream_dtype)   # [8, 16]
    b2 = params["b2"].astype(jnp.float32)    # [8, 1]
    w3 = params["w3"].astype(stream_dtype)   # [1, 8]
    b3 = params["b3"].astype(jnp.float32)    # [1, 1]

    grid = (b_pad // tb,)

    out_t = pl.pallas_call(
        heartnet_kernel,
        out_shape=jax.ShapeDtypeStruct((1, b_pad), jnp.float32),
        grid=grid,
        in_specs=[
            # x tile streams along the batch (lane) axis -> pipelined DMA.
            pl.BlockSpec((F, tb), lambda i: (0, i)),
            # Weights / biases: constant index_map -> resident in VMEM across steps.
            pl.BlockSpec((16, F), lambda i: (0, 0)),
            pl.BlockSpec((16, 1), lambda i: (0, 0)),
            pl.BlockSpec((8, 16), lambda i: (0, 0)),
            pl.BlockSpec((8, 1), lambda i: (0, 0)),
            pl.BlockSpec((1, 8), lambda i: (0, 0)),
            pl.BlockSpec((1, 1), lambda i: (0, 0)),
        ],
        out_specs=pl.BlockSpec((1, tb), lambda i: (0, i)),
        compiler_params=pltpu.CompilerParams(
            dimension_semantics=("parallel",),
        ),
    )(x_t, w1, b1, w2, b2, w3, b3)

    # Drop batch padding and return the PyTorch-shaped [B, 1] output.
    return jnp.transpose(out_t[:, :B])


def init_params(key, input_size):
    """Deterministic synthetic init (shapes match nn.Linear layers, [out, in])."""
    k1, k2, k3 = jax.random.split(key, 3)
    w1 = jax.random.normal(k1, (16, input_size), jnp.float32) / jnp.sqrt(input_size * 1.0)
    b1 = jnp.zeros((16, 1), jnp.float32)
    w2 = jax.random.normal(k2, (8, 16), jnp.float32) / jnp.sqrt(16.0)
    b2 = jnp.zeros((8, 1), jnp.float32)
    w3 = jax.random.normal(k3, (1, 8), jnp.float32) / jnp.sqrt(8.0)
    b3 = jnp.zeros((1, 1), jnp.float32)
    return {"w1": w1, "b1": b1, "w2": w2, "b2": b2, "w3": w3, "b3": b3}


def _reference(x, params):
    h1 = jnp.maximum(x @ params["w1"].T + params["b1"].T, 0.0)
    h2 = jnp.maximum(h1 @ params["w2"].T + params["b2"].T, 0.0)
    return jax.nn.sigmoid(h2 @ params["w3"].T + params["b3"].T)


if __name__ == "__main__":
    key = jax.random.PRNGKey(0)
    kx, kx2, kp = jax.random.split(key, 3)

    F = 13  # classic heart-disease dataset width
    params = init_params(kp, F)

    # Small batch (single grid step).
    B = 256
    x = jax.random.normal(kx, (B, F), jnp.float32)
    out = jax.block_until_ready(heartnet_forward(x, params))
    ref = _reference(x, params)
    assert out.shape == (B, 1)
    assert jnp.allclose(out, ref, atol=1e-5, rtol=1e-5)

    # Non-multiple-of-tile batch (exercises padding + multiple grid steps).
    B2 = 1000
    x2 = jax.random.normal(kx2, (B2, F), jnp.float32)
    out2 = jax.block_until_ready(heartnet_forward(x2, params))
    ref2 = _reference(x2, params)
    assert out2.shape == (B2, 1)
    assert jnp.allclose(out2, ref2, atol=1e-5, rtol=1e-5)

    # bf16-streamed path (halves HBM read traffic; f32 accumulation inside).
    out_bf16 = jax.block_until_ready(
        heartnet_forward(x2, params, stream_dtype=jnp.bfloat16))
    assert jnp.allclose(out_bf16, ref2, atol=3e-2)

    print("KERNEL_OK")
</pallas_src>

<mosaic_0001>
module attributes {stable_mosaic.version = 11 : i64} {
  func.func @heartnet_kernel(%arg0: i32, %arg1: memref<13x256xf32, #tpu.memory_space<vmem>>, %arg2: memref<16x13xf32, #tpu.memory_space<vmem>>, %arg3: memref<16x1xf32, #tpu.memory_space<vmem>>, %arg4: memref<8x16xf32, #tpu.memory_space<vmem>>, %arg5: memref<8x1xf32, #tpu.memory_space<vmem>>, %arg6: memref<1x8xf32, #tpu.memory_space<vmem>>, %arg7: memref<1x1xf32, #tpu.memory_space<vmem>>, %arg8: memref<1x256xf32, #tpu.memory_space<vmem>>) attributes {dimension_semantics = [#tpu.dimension_semantics<parallel>], iteration_bounds = array<i64: 1>, scalar_prefetch = 0 : i64, scratch_operands = 0 : i64, tpu.core_type = #tpu.core_type<tc>, window_params = [{transform_indices = @transform_0, window_bounds = array<i64: 13, 256>}, {pipeline_mode = #tpu.pipeline_mode<synchronous>, transform_indices = @transform_1, window_bounds = array<i64: 16, 13>}, {pipeline_mode = #tpu.pipeline_mode<synchronous>, transform_indices = @transform_2, window_bounds = array<i64: 16, 1>}, {pipeline_mode = #tpu.pipeline_mode<synchronous>, transform_indices = @transform_3, window_bounds = array<i64: 8, 16>}, {pipeline_mode = #tpu.pipeline_mode<synchronous>, transform_indices = @transform_4, window_bounds = array<i64: 8, 1>}, {pipeline_mode = #tpu.pipeline_mode<synchronous>, transform_indices = @transform_5, window_bounds = array<i64: 1, 8>}, {pipeline_mode = #tpu.pipeline_mode<synchronous>, transform_indices = @transform_6, window_bounds = array<i64: 1, 1>}, {transform_indices = @transform_7, window_bounds = array<i64: 1, 256>}]} {
    %c0 = arith.constant 0 : index
    %c0_0 = arith.constant 0 : index
    %0 = vector.load %arg1[%c0, %c0_0] : memref<13x256xf32, #tpu.memory_space<vmem>>, vector<13x256xf32>
    %c0_1 = arith.constant 0 : index
    %c0_2 = arith.constant 0 : index
    %1 = vector.load %arg2[%c0_1, %c0_2] : memref<16x13xf32, #tpu.memory_space<vmem>>, vector<16x13xf32>
    %cst = arith.constant dense<0.000000e+00> : vector<16x256xf32>
    %2 = tpu.matmul %1, %0, %cst {dimension_numbers = #tpu.dot_dimension_numbers<[1], [0], [0], [1], [0, 0, 1, 1], [], []>} : vector<16x13xf32>, vector<13x256xf32>, vector<16x256xf32> -> vector<16x256xf32>
    %c0_3 = arith.constant 0 : index
    %c0_4 = arith.constant 0 : index
    %3 = vector.load %arg3[%c0_3, %c0_4] : memref<16x1xf32, #tpu.memory_space<vmem>>, vector<16x1xf32>
    %4 = vector.broadcast %3 : vector<16x1xf32> to vector<16x256xf32>
    %5 = arith.addf %2, %4 : vector<16x256xf32>
    %cst_5 = arith.constant 0.000000e+00 : f32
    %6 = vector.broadcast %cst_5 : f32 to vector<16x256xf32>
    %7 = arith.maximumf %5, %6 : vector<16x256xf32>
    %c0_6 = arith.constant 0 : index
    %c0_7 = arith.constant 0 : index
    %8 = vector.load %arg4[%c0_6, %c0_7] : memref<8x16xf32, #tpu.memory_space<vmem>>, vector<8x16xf32>
    %cst_8 = arith.constant dense<0.000000e+00> : vector<8x256xf32>
    %9 = tpu.matmul %8, %7, %cst_8 {dimension_numbers = #tpu.dot_dimension_numbers<[1], [0], [0], [1], [0, 0, 1, 1], [], []>} : vector<8x16xf32>, vector<16x256xf32>, vector<8x256xf32> -> vector<8x256xf32>
    %c0_9 = arith.constant 0 : index
    %c0_10 = arith.constant 0 : index
    %10 = vector.load %arg5[%c0_9, %c0_10] : memref<8x1xf32, #tpu.memory_space<vmem>>, vector<8x1xf32>
    %11 = vector.broadcast %10 : vector<8x1xf32> to vector<8x256xf32>
    %12 = arith.addf %9, %11 : vector<8x256xf32>
    %cst_11 = arith.constant 0.000000e+00 : f32
    %13 = vector.broadcast %cst_11 : f32 to vector<8x256xf32>
    %14 = arith.maximumf %12, %13 : vector<8x256xf32>
    %c0_12 = arith.constant 0 : index
    %c0_13 = arith.constant 0 : index
    %15 = vector.load %arg6[%c0_12, %c0_13] : memref<1x8xf32, #tpu.memory_space<vmem>>, vector<1x8xf32>
    %cst_14 = arith.constant dense<0.000000e+00> : vector<1x256xf32>
    %16 = tpu.matmul %15, %14, %cst_14 {dimension_numbers = #tpu.dot_dimension_numbers<[1], [0], [0], [1], [0, 0, 1, 1], [], []>} : vector<1x8xf32>, vector<8x256xf32>, vector<1x256xf32> -> vector<1x256xf32>
    %c0_15 = arith.constant 0 : index
    %c0_16 = arith.constant 0 : index
    %17 = vector.load %arg7[%c0_15, %c0_16] : memref<1x1xf32, #tpu.memory_space<vmem>>, vector<1x1xf32>
    %18 = vector.broadcast %17 : vector<1x1xf32> to vector<1x256xf32>
    %19 = arith.addf %16, %18 : vector<1x256xf32>
    %cst_17 = arith.constant 0.000000e+00 : f32
    %20 = vector.broadcast %cst_17 : f32 to vector<1x256xf32>
    %21 = arith.subf %20, %19 : vector<1x256xf32>
    %22 = math.exp %21 : vector<1x256xf32>
    %cst_18 = arith.constant 1.000000e+00 : f32
    %23 = vector.broadcast %cst_18 : f32 to vector<1x256xf32>
    %24 = arith.addf %23, %22 : vector<1x256xf32>
    %cst_19 = arith.constant 1.000000e+00 : f32
    %25 = vector.broadcast %cst_19 : f32 to vector<1x256xf32>
    %26 = arith.divf %25, %24 : vector<1x256xf32>
    %c0_20 = arith.constant 0 : index
    %c0_21 = arith.constant 0 : index
    %27 = vector.load %arg8[%c0_20, %c0_21] : memref<1x256xf32, #tpu.memory_space<vmem>>, vector<1x256xf32>
    tpu.vector_store %arg8[%c0_20, %c0_21], %26 {strides = array<i32>} : memref<1x256xf32, #tpu.memory_space<vmem>>, vector<1x256xf32>,
    return
  }
  func.func @transform_0(%arg0: i32) -> (i32, i32) {
    %c0_i32 = arith.constant 0 : i32
    %c0_i32_0 = arith.constant 0 : i32
    return %c0_i32, %arg0 : i32, i32
  }
  func.func @transform_1(%arg0: i32) -> (i32, i32) {
    %c0_i32 = arith.constant 0 : i32
    %c0_i32_0 = arith.constant 0 : i32
    %c0_i32_1 = arith.constant 0 : i32
    return %c0_i32, %c0_i32_0 : i32, i32
  }
  func.func @transform_2(%arg0: i32) -> (i32, i32) {
    %c0_i32 = arith.constant 0 : i32
    %c0_i32_0 = arith.constant 0 : i32
    %c0_i32_1 = arith.constant 0 : i32
    return %c0_i32, %c0_i32_0 : i32, i32
  }
  func.func @transform_3(%arg0: i32) -> (i32, i32) {
    %c0_i32 = arith.constant 0 : i32
    %c0_i32_0 = arith.constant 0 : i32
    %c0_i32_1 = arith.constant 0 : i32
    return %c0_i32, %c0_i32_0 : i32, i32
  }
  func.func @transform_4(%arg0: i32) -> (i32, i32) {
    %c0_i32 = arith.constant 0 : i32
    %c0_i32_0 = arith.constant 0 : i32
    %c0_i32_1 = arith.constant 0 : i32
    return %c0_i32, %c0_i32_0 : i32, i32
  }
  func.func @transform_5(%arg0: i32) -> (i32, i32) {
    %c0_i32 = arith.constant 0 : i32
    %c0_i32_0 = arith.constant 0 : i32
    %c0_i32_1 = arith.constant 0 : i32
    return %c0_i32, %c0_i32_0 : i32, i32
  }
  func.func @transform_6(%arg0: i32) -> (i32, i32) {
    %c0_i32 = arith.constant 0 : i32
    %c0_i32_0 = arith.constant 0 : i32
    %c0_i32_1 = arith.constant 0 : i32
    return %c0_i32, %c0_i32_0 : i32, i32
  }
  func.func @transform_7(%arg0: i32) -> (i32, i32) {
    %c0_i32 = arith.constant 0 : i32
    %c0_i32_0 = arith.constant 0 : i32
    return %c0_i32, %arg0 : i32, i32
  }
}

</mosaic_0001>

<bundles_post_ra>
// kernel: heartnet_forward.1
= control target key start
LH: loop header
LB: loop body
LE: loop exit
PB: predicated region body
PF: predicated region fallthrough
CT: control target
= control target key end

     0   :  { %s520_s0 = inlined_call_operand.hbm [shape: f32[13,256], index: 0, kind: input, shape index: {}]   ;;  %s521_s1 = inlined_call_operand.vmem [shape: f32[16,13], index: 1, kind: input, shape index: {}]   ;;  %s522_s2 = inlined_call_operand.vmem [shape: f32[16,1], index: 2, kind: input, shape index: {}]   ;;  %s523_s3 = inlined_call_operand.vmem [shape: f32[8,16], index: 3, kind: input, shape index: {}]   ;;  %s524_s4 = inlined_call_operand.vmem [shape: f32[8,1], index: 4, kind: input, shape index: {}]   ;;  %s525_s5 = inlined_call_operand.vmem [shape: f32[1,8], index: 5, kind: input, shape index: {}]   ;;  %s526_s6 = inlined_call_operand.<no memory space> [shape: f32[1,1], index: 6, kind: input, shape index: {}]   ;;  %s527_s7 = inlined_call_operand.hbm [shape: f32[1,256], index: 7, kind: output, shape index: {}]  }
   0x1   :  { %v12_v0 = vstv %s526_s6 }
   0x2   :  { %13 = vst [vmem:[#allocation2] sm:$0x1] %v12_v0 }
   0x3   :  { %14 = vsyncpa [#allocation4], 0 }
   0x4   :  { %15 = vsyncpa [#allocation5], 0  ;;  %s443_s26 = smov [#allocation3]  }
   0x5   :  { %s21_s27 = sshll.u32 %s443_s26, 4  ;;  %s22_s27 = int_to_ptr.vmem [resolvable:$true] %s21_s27 }
   0x6   :  { %s407_s28 = scalar_lea.vmem %s22_s27, 512  ;;  %p412_p1 = scmp.lt.s32.totalorder %s22_s27, %s22_s27 }
   0x7   :  { %p408_p0 = scmp.ne.s32.totalorder %s22_s27, %s407_s28  ;;  %p413_p2 = scmp.lt.s32.totalorder %s407_s28, %s407_s28 }
   0x9   :  { %p414_p3 = por %p413_p2, %p412_p1 }
   0xb   :  { %p415_p4 = pnand %p414_p3, %p408_p0 }
   0xd   :  { %418 = shalt.err (!%p415_p4)
}
   0xe   :  { %s444_s29 = smov 256   ;;  %s445_s30 = smov 16  }
   0xf   :  { %27 = dma.hbm_to_vmem [thread:$0]  %s520_s0, 512, %s22_s27, [#allocation4], %s444_s29, %s444_s29, %s445_s30  }
  0x10   :  { %439 = dma.done.wait [#allocation4], 512  }
  0x11   :  { %440 = vsyncadd [#allocation4], 4294966784  ;;  %v446_v1 = vmov 0.0   ;;  %v447_v2 = vmov 0   ;;  %vm68_vm0 = vcmask 1044480   ;;  %v44_v5 = vld [vmem:[#allocation3 + $0x8] sm:$0xff]  ;;  %v247_v36 = vlaneseq }
  0x12   :  { %139 = vmatprep.mubr.f32.mxu0 %v446_v1  ;;  %389 = vset.pattern.permute.xlu0 %v447_v2  ;;  %v46_v3 = vld [vmem:[#allocation3 + $0x18] sm:$0x1f]  ;;  %v45_v4 = vld [vmem:[#allocation3 + $0x10] sm:$0x1f]  ;;  %v43_v6 = vld [vmem:[#allocation3] sm:$0xff]  ;;  %vm61_vm1 = vcmask 105472  }
  0x13   :  { %231 = vmatprep.mubr.f32.mxu1 %v446_v1  ;;  %390 = vset.pattern.permute.xlu1 %v447_v2  ;;  %v47_v7 = vld [vmem:[%s521_s1] sm:$0xff]  ;;  %v50_v8 = vld [vmem:[%s522_s2 + $0x8] sm:$0xff]  ;;  %vm163_vm2 = vcmask 130048   ;;  %vm251_vm3 = vcmask 64512   ;;  %v248_v37 = vshrl.u32 %v247_v36, 7  ;;  %vm358_vm4 = vcmp.lt.s32.totalorder %v247_v36, 256 }
  0x14   :  { %376 = vmatprep.subr.msk.mxu0 %vm68_vm0, %v46_v3  ;;  %58 = vperm.xlu0 %389, %v50_v8   ;;  %v49_v9 = vld [vmem:[%s522_s2] sm:$0xff]  ;;  %v48_v10 = vld [vmem:[%s521_s1 + $0x8] sm:$0xff]  ;;  %v448_v53 = vmov 1966171168  }
  0x15   :  { %377 = vmatpush1.msk.msra.mxu0 %vm68_vm0, %v45_v4  ;;  %v157_v11 = vld [vmem:[%s524_s4] sm:$0xff]  ;;  %v249_v38 = vsub.s32 0, %v248_v37  ;;  %v342_v54 = vunpack.c.l.s4 %v448_v53 }
  0x16   :  { %105 = vmatprep.subr.mxu0 %v44_v5  ;;  %160 = vperm.xlu1 %390, %v157_v11   ;;  %v241_v12 = vld [vmem:[#allocation2] sm:$0x1] }
  0x17   :  { %106 = vmatpush1.msra.mxu0 %v43_v6  ;;  %v156_v27 = vld [vmem:[%s523_s3] sm:$0xff]  ;;  %v343_v55 = vunpack.c.0.s8 %v342_v54  ;;  %s449_s3 = smov [#allocation6]  }
  0x18   :  { %378 = vmatmul.mubr.msk.f32.vlgmr.msra.gmra.mxu0 %vm61_vm1, %v47_v7  ;;  %53 = vperm.xlu0 %389, %v49_v9   ;;  %v240_v35 = vld [vmem:[%s525_s5] sm:$0x1]  ;;  %s367_s5 = sshll.u32 %s449_s3, 4  ;;  %s368_s5 = int_to_ptr.vmem [resolvable:$true] %s367_s5 }
  0x19   :  { %145 = vmatprep.mubr.f32.mxu0 %v446_v1  ;;  %v346_v57 = vsub.s32 %v343_v55, %v248_v37  ;;  %s419_s19 = scalar_lea.vmem %s368_s5, 32  ;;  %p424_p6 = scmp.lt.s32.totalorder %s368_s5, %s368_s5 }
  0x1a   :  { %244 = vperm.xlu1 %390, %v241_v12   ;;  %p420_p5 = scmp.ne.s32.totalorder %s368_s5, %s419_s19  ;;  %p425_p7 = scmp.lt.s32.totalorder %s419_s19, %s419_s19 }
  0x1c   :  { %379 = vmatmul.mubr.msk.f32.gmra.mxu0 %vm61_vm1, %v48_v10  ;;  %p426_p8 = por %p425_p7, %p424_p6 }
  0x1e   :  { %p427_p9 = pnand %p426_p8, %p420_p5 }
  0x8f   :  { %v59_v13 = vpop.permute.xlu0 %58 }
  0x91   :  { %v161_v29 = vpop.permute.xlu1 %160 }
  0x93   :  { %v54_v17 = vpop.permute.xlu0 %53 }
  0x95   :  { %v245_v39 = vpop.permute.xlu1 %244 }
  0x96   :  { %v250_v40 = vrot.slane %v245_v39, %v249_v38 }
  0xd8   :  { %v141_v14 = vpop.f32.mrf.mxu0 }
  0xd9   :  { %v142_v22 = vadd.f32 %v141_v14, %v54_v17 }
  0xda   :  { %v143_v15 = vpop.f32.mrf.mxu0 }
  0xdb   :  { %v144_v20 = vadd.f32 %v143_v15, %v54_v17  ;;  %v152_v26 = vmax.f32 %v142_v22, 0.0 }
  0xdc   :  { %v147_v16 = vpop.f32.mrf.mxu0 }
  0xdd   :  { %v148_v18 = vadd.f32 %v147_v16, %v59_v13  ;;  %v153_v25 = vmax.f32 %v144_v20, 0.0 }
  0xde   :  { %v149_v19 = vpop.f32.mrf.mxu0 }
  0xdf   :  { %v150_v21 = vadd.f32 %v149_v19, %v59_v13  ;;  %v154_v24 = vmax.f32 %v148_v18, 0.0 }
  0xe1   :  { %v155_v23 = vmax.f32 %v150_v21, 0.0 }
  0xe3   :  { %195 = vmatprep.subr.mxu1 %v155_v23 }
  0xe4   :  { %196 = vmatpush1.msra.mxu1 %v154_v24 }
  0xe5   :  { %197 = vmatprep.subr.mxu1 %v153_v25 }
  0xe6   :  { %198 = vmatpush1.msra.mxu1 %v152_v26 }
  0xe7   :  { %380 = vmatmul.mubr.msk.f32.vlgmr.msra.gmra.mxu1 %vm163_vm2, %v156_v27 }
  0xe8   :  { %319 = vmatprep.mubr.f32.mxu1 %v446_v1 }
 0x1a7   :  { %v233_v28 = vpop.f32.mrf.mxu1 }
 0x1a8   :  { %v234_v30 = vadd.f32 %v233_v28, %v161_v29 }
 0x1a9   :  { %v235_v31 = vpop.f32.mrf.mxu1 }
 0x1aa   :  { %v236_v32 = vadd.f32 %v235_v31, %v161_v29  ;;  %v238_v34 = vmax.f32 %v234_v30, 0.0 }
 0x1ac   :  { %v239_v33 = vmax.f32 %v236_v32, 0.0 }
 0x1ae   :  { %285 = vmatprep.subr.mxu1 %v239_v33 }
 0x1af   :  { %286 = vmatpush1.msra.mxu1 %v238_v34 }
 0x1b0   :  { %381 = vmatmul.mubr.msk.f32.vlgmr.msra.gmra.mxu1 %vm251_vm3, %v240_v35 }
 0x270   :  { %v321_v41 = vpop.f32.mrf.mxu1 }
 0x271   :  { %v322_v42 = vadd.f32 %v321_v41, %v250_v40 }
 0x272   :  { %v323_v43 = vpop.f32.mrf.mxu1 }
 0x273   :  { %v326_v44 = vsub.f32 0.0, %v322_v42  ;;  %v324_v45 = vadd.f32 %v323_v43, %v250_v40 }
 0x275   :  { %v328_v46 = vmul.f32 1.442695, %v326_v44  ;;  %v327_v47 = vsub.f32 0.0, %v324_v45 }
 0x277   :  { %391 = vpow2.f32 %v328_v46  ;;  %v330_v48 = vmul.f32 1.442695, %v327_v47 }
 0x279   :  { %393 = vpow2.f32 %v330_v48 }
 0x284   :  { %v392_v49 = vpop.eup %391 }
 0x285   :  { %v332_v50 = vadd.f32 1.0, %v392_v49 }
 0x286   :  { %v394_v51 = vpop.eup %393 }
 0x287   :  { %v333_v52 = vadd.f32 1.0, %v394_v51  ;;  %395 = vrcp.f32 %v332_v50 }
 0x289   :  { %397 = vrcp.f32 %v333_v52 }
 0x294   :  { %v396_v56 = vpop.eup %395 }
 0x296   :  { %v398_v58 = vpop.eup %397 }
 0x297   :  { %v340_v59 = vcombine.low %v396_v56, %v398_v58 }
 0x299   :  { %v347_v60 = vrot.slane %v340_v59, %v346_v57 }
 0x29b   :  { %v354_v61 = vrot.slane %v347_v60, %v346_v57 }
 0x29d   :  { %360 = vst.msk [vmem:[#allocation6] sm:$0x3] %vm358_vm4, %v354_v61 }
 0x29e   :  { %430 = shalt.err (!%p427_p9)
}
 0x29f   :  { %370 = dma.vmem_to_hbm [thread:$0]  %s368_s5, 32, %s527_s7, [#allocation5]  }
 0x2a0   :  { %441 = dma.done.wait [#allocation5], 32  }
 0x2a1   :  { %442 = vsyncadd [#allocation5], 4294967264 }
 0x2a2   :  { %374 = vsyncpa [#allocation4], 1 }
 0x2a3   :  { %375 = vsyncpa [#allocation5], 1 }

</bundles_post_ra>
